<compile_context>
chip_gen: v7x
topology: tpu7x:2x2x1
jax: 0.10.0
libtpu: 0.0.40
codegen_flags: <defaults>
</compile_context>

<pallas_src>
import functools

import jax
import jax.numpy as jnp
from jax.experimental import pallas as pl
from jax.experimental.pallas import tpu as pltpu

_NSPLIT = 2        # leading "parallel" grid axis (one chunk per TensorCore on v7x)
_LANES = 128
_SUBLANES = 8


def _round_up(x, m):
    return (x + m - 1) // m * m


# ---------------------------------------------------------------------------
# Kernels
# ---------------------------------------------------------------------------
def _d_kernel(p_ref, z_ref, out_ref, acc_ref):
    """Plain D() path.

    p_ref / z_ref: (TB, Dpad) row tiles of the concatenated (2B, D) embeddings.
    Accumulates sum_b cos(p_b, z_b) for this split into acc_ref and writes the
    splatted partial sum once at the last inner grid step.
    """
    i = pl.program_id(1)

    @pl.when(i == 0)
    def _():
        acc_ref[...] = jnp.zeros_like(acc_ref)

    p = p_ref[...].astype(jnp.float32)
    z = z_ref[...].astype(jnp.float32)
    dot = jnp.sum(p * z, axis=-1, keepdims=True)          # (TB, 1)
    pp = jnp.sum(p * p, axis=-1, keepdims=True)
    zz = jnp.sum(z * z, axis=-1, keepdims=True)
    denom = pp * zz
    # Zero-padded rows have denom == 0 and dot == 0 -> contribute exactly 0.
    # (Also avoids inf/NaN; the PyTorch reference has no eps and would NaN.)
    sim = dot * jax.lax.rsqrt(jnp.where(denom > 0.0, denom, 1.0))
    acc_ref[...] += jnp.sum(sim)                           # scalar splat-add

    @pl.when(i == pl.num_programs(1) - 1)
    def _():
        out_ref[...] = acc_ref[...]


def _dmin_kernel(p_ref, z_ref, out_ref, acc_ref, *, n_valid):
    """minimize_loss=True path.

    p_ref / z_ref: (1, Npad, Dpad) = one batch element of the concatenated
    (2B, N, D) embeddings.  Accumulates sum_b mean_n max_m cos(p_bn, z_bm).
    """
    i = pl.program_id(1)

    @pl.when(i == 0)
    def _():
        acc_ref[...] = jnp.zeros_like(acc_ref)

    p = p_ref[0]                       # (Npad, Dpad), original dtype (MXU path)
    z = z_ref[0]
    pf = p.astype(jnp.float32)
    zf = z.astype(jnp.float32)
    pp = jnp.sum(pf * pf, axis=-1, keepdims=True)          # (Npad, 1)
    zz = jnp.sum(zf * zf, axis=-1, keepdims=True)          # (Npad, 1)
    inv_p = jax.lax.rsqrt(jnp.where(pp > 0.0, pp, 1.0))
    inv_z = jax.lax.rsqrt(jnp.where(zz > 0.0, zz, 1.0))

    # Normalize z rows before the bmm (one cheap multiply, stays in the input
    # dtype for the MXU); p's normalization is a row scale of the score tile.
    z_n = (zf * inv_z).astype(z.dtype)
    raw = jax.lax.dot_general(p, z_n, (((1,), (1,)), ((), ())),
                              preferred_element_type=jnp.float32)   # (Npad, Npad)
    sim = raw * inv_p                                      # scale rows by 1/||p_n||

    npad = sim.shape[0]
    col = jax.lax.broadcasted_iota(jnp.int32, (npad, npad), 1)
    sim = jnp.where(col < n_valid, sim, -jnp.inf)          # ignore padded m columns
    row_max = jnp.max(sim, axis=-1, keepdims=True)         # (Npad, 1)
    # Padded n-rows and padded batch elements are all-zero -> row_max == 0.
    acc_ref[...] += jnp.sum(row_max) * (1.0 / n_valid)

    @pl.when(i == pl.num_programs(1) - 1)
    def _():
        out_ref[...] = acc_ref[...]


# ---------------------------------------------------------------------------
# pallas_call wrappers
# ---------------------------------------------------------------------------
_COMPILER_PARAMS = pltpu.CompilerParams(
    dimension_semantics=("parallel", "arbitrary"),
    vmem_limit_bytes=32 * 1024 * 1024,
)
_OUT_SHAPE = jax.ShapeDtypeStruct((_NSPLIT, _SUBLANES, _LANES), jnp.float32)
_OUT_SPEC = pl.BlockSpec((1, _SUBLANES, _LANES), lambda c, i: (c, 0, 0))
_ACC_SCRATCH = pltpu.VMEM((1, _SUBLANES, _LANES), jnp.float32)


def _run_d(p, z):
    """p, z: (R, D) concatenated embeddings.  Returns sum_b cos(p_b, z_b)."""
    r, d = p.shape
    dpad = _round_up(d, _LANES)
    itemsize = p.dtype.itemsize
    # 2 inputs x 2 pipeline buffers must fit comfortably in scoped VMEM
    # (32 MiB default on v6e / v7x): keep 4 * TB * Dpad * itemsize <= ~16 MiB.
    tb = min(512, max(_SUBLANES, (16 * 1024 * 1024) // (4 * dpad * itemsize)))
    tb = max(_SUBLANES, (tb // _SUBLANES) * _SUBLANES)
    rows_per_split = _round_up(-(-r // _NSPLIT), _SUBLANES)
    tb = min(tb, rows_per_split)
    rpad = _round_up(r, tb * _NSPLIT)
    if (rpad, dpad) != (r, d):
        p = jnp.pad(p, ((0, rpad - r), (0, dpad - d)))
        z = jnp.pad(z, ((0, rpad - r), (0, dpad - d)))
    tiles_per_split = rpad // tb // _NSPLIT

    in_spec = pl.BlockSpec((tb, dpad),
                           lambda c, i, t=tiles_per_split: (c * t + i, 0))
    out = pl.pallas_call(
        _d_kernel,
        out_shape=_OUT_SHAPE,
        grid_spec=pltpu.PrefetchScalarGridSpec(
            num_scalar_prefetch=0,
            grid=(_NSPLIT, tiles_per_split),
            in_specs=[in_spec, in_spec],
            out_specs=_OUT_SPEC,
            scratch_shapes=[_ACC_SCRATCH]),
        compiler_params=_COMPILER_PARAMS,
    )(p, z)
    return jnp.sum(out[:, 0, 0])


def _run_dmin(p, z):
    """p, z: (R, N, D) concatenated embeddings.
    Returns sum_b mean_n max_m cos(p_bn, z_bm)."""
    r, n, d = p.shape
    dpad = _round_up(d, _LANES)
    npad = _round_up(n, _LANES) if n > 64 else _round_up(n, _SUBLANES)
    bps = -(-r // _NSPLIT)                 # batch elements per split
    rpad = bps * _NSPLIT
    if (rpad, npad, dpad) != (r, n, d):
        pads = ((0, rpad - r), (0, npad - n), (0, dpad - d))
        p = jnp.pad(p, pads)
        z = jnp.pad(z, pads)

    # TODO(synk): tile the (N, M) score matrix for very large N instead of one
    # (Npad, Npad) block per batch element.
    kernel = functools.partial(_dmin_kernel, n_valid=n)
    in_spec = pl.BlockSpec((1, npad, dpad),
                           lambda c, i, b=bps: (c * b + i, 0, 0))
    out = pl.pallas_call(
        kernel,
        out_shape=_OUT_SHAPE,
        grid_spec=pltpu.PrefetchScalarGridSpec(
            num_scalar_prefetch=0,
            grid=(_NSPLIT, bps),
            in_specs=[in_spec, in_spec],
            out_specs=_OUT_SPEC,
            scratch_shapes=[_ACC_SCRATCH]),
        compiler_params=_COMPILER_PARAMS,
    )(p, z)
    return jnp.sum(out[:, 0, 0])


def simsiam_loss(outputs, minimize_loss=False, symmetry=True):
    """JAX/Pallas equivalent of SimsiamLoss.forward (symmetry=True path)."""
    assert symmetry, "only symmetry=True is defined by the reference module"
    p1 = outputs['aug1_embed']
    z1 = jax.lax.stop_gradient(outputs['z1'])   # z.detach()
    p2 = outputs['aug2_embed']
    z2 = jax.lax.stop_gradient(outputs['z2'])

    # -0.5 * (D*(p1, z2) + D*(p2, z1)) == -(1 / (2B)) * sum over concat batch.
    p = jnp.concatenate([p1, p2], axis=0)
    z = jnp.concatenate([z2, z1], axis=0)
    total = p.shape[0]                         # = 2B
    s = _run_dmin(p, z) if minimize_loss else _run_d(p, z)
    return -s / total


# ---------------------------------------------------------------------------
# Pure-JAX reference (numerical sanity check)
# ---------------------------------------------------------------------------
def _ref_D(p, z):
    pn = p / jnp.linalg.norm(p, axis=-1, keepdims=True)
    zn = z / jnp.linalg.norm(z, axis=-1, keepdims=True)
    return jnp.mean(jnp.sum(pn * zn, axis=-1))


def _ref_D_minimize(p, z):
    pn = p / jnp.linalg.norm(p, axis=-1, keepdims=True)
    zn = z / jnp.linalg.norm(z, axis=-1, keepdims=True)
    sim = jnp.einsum('bnd,bmd->bnm', pn, zn)
    return jnp.mean(jnp.mean(jnp.max(sim, axis=-1), axis=-1))


def _ref_loss(outputs, minimize_loss=False):
    p1, z1 = outputs['aug1_embed'], outputs['z1']
    p2, z2 = outputs['aug2_embed'], outputs['z2']
    fn = _ref_D_minimize if minimize_loss else _ref_D
    return -0.5 * (fn(p1, z2) + fn(p2, z1))


# ---------------------------------------------------------------------------
# Main
# ---------------------------------------------------------------------------
if __name__ == "__main__":
    key = jax.random.PRNGKey(0)

    # --- plain D() path: embeddings are (batch, hidden) = (8, 32) ---
    B, H = 8, 32
    k1, k2, k3, k4, key = jax.random.split(key, 5)
    outputs_2d = {
        'aug1_embed': jax.random.normal(k1, (B, H), jnp.float32),
        'z1':         jax.random.normal(k2, (B, H), jnp.float32),
        'aug2_embed': jax.random.normal(k3, (B, H), jnp.float32),
        'z2':         jax.random.normal(k4, (B, H), jnp.float32),
    }
    loss = simsiam_loss(outputs_2d, minimize_loss=False)
    loss = jax.block_until_ready(loss)
    ref = _ref_loss(outputs_2d, minimize_loss=False)
    assert jnp.allclose(loss, ref, atol=1e-5, rtol=1e-5), (loss, ref)

    # --- D_minimize() path: embeddings are (batch, seq, hidden) = (2, 8, 32) ---
    Bm, N, Hm = 2, 8, 32
    k1, k2, k3, k4, key = jax.random.split(key, 5)
    outputs_3d = {
        'aug1_embed': jax.random.normal(k1, (Bm, N, Hm), jnp.float32),
        'z1':         jax.random.normal(k2, (Bm, N, Hm), jnp.float32),
        'aug2_embed': jax.random.normal(k3, (Bm, N, Hm), jnp.float32),
        'z2':         jax.random.normal(k4, (Bm, N, Hm), jnp.float32),
    }
    loss_min = simsiam_loss(outputs_3d, minimize_loss=True)
    loss_min = jax.block_until_ready(loss_min)
    ref_min = _ref_loss(outputs_3d, minimize_loss=True)
    assert jnp.allclose(loss_min, ref_min, atol=1e-5, rtol=1e-5), (loss_min, ref_min)

    print("KERNEL_OK")
</pallas_src>

<mosaic_0001>
module attributes {stable_mosaic.version = 11 : i64} {
  func.func @_d_kernel(%arg0: i32, %arg1: i32, %arg2: memref<8x128xf32, #tpu.memory_space<vmem>>, %arg3: memref<8x128xf32, #tpu.memory_space<vmem>>, %arg4: memref<1x8x128xf32, #tpu.memory_space<vmem>>, %arg5: memref<1x8x128xf32, #tpu.memory_space<vmem>>) attributes {dimension_semantics = [#tpu.dimension_semantics<parallel>, #tpu.dimension_semantics<arbitrary>], iteration_bounds = array<i64: 2, 1>, scalar_prefetch = 0 : i64, scratch_operands = 1 : i64, tpu.core_type = #tpu.core_type<tc>, window_params = [{transform_indices = @transform_0, window_bounds = array<i64: 8, 128>}, {transform_indices = @transform_1, window_bounds = array<i64: 8, 128>}, {transform_indices = @transform_2, window_bounds = array<i64: 1, 8, 128>}]} {
    %c0_i32 = arith.constant 0 : i32
    %0 = arith.cmpi eq, %arg1, %c0_i32 : i32
    %1 = arith.extui %0 : i1 to i32
    %c0_i32_0 = arith.constant 0 : i32
    %2 = arith.cmpi ne, %1, %c0_i32_0 : i32
    scf.if %2 {
      %cst_17 = arith.constant 0.000000e+00 : f32
      %32 = vector.broadcast %cst_17 : f32 to vector<1x8x128xf32>
      %c0_18 = arith.constant 0 : index
      %c0_19 = arith.constant 0 : index
      %c0_20 = arith.constant 0 : index
      %33 = vector.load %arg5[%c0_18, %c0_19, %c0_20] : memref<1x8x128xf32, #tpu.memory_space<vmem>>, vector<1x8x128xf32>
      tpu.vector_store %arg5[%c0_18, %c0_19, %c0_20], %32 {strides = array<i32>} : memref<1x8x128xf32, #tpu.memory_space<vmem>>, vector<1x8x128xf32>,
    } else {
    }
    %c0 = arith.constant 0 : index
    %c0_1 = arith.constant 0 : index
    %3 = vector.load %arg2[%c0, %c0_1] : memref<8x128xf32, #tpu.memory_space<vmem>>, vector<8x128xf32>
    %c0_2 = arith.constant 0 : index
    %c0_3 = arith.constant 0 : index
    %4 = vector.load %arg3[%c0_2, %c0_3] : memref<8x128xf32, #tpu.memory_space<vmem>>, vector<8x128xf32>
    %5 = arith.mulf %3, %4 : vector<8x128xf32>
    %cst = arith.constant dense<0.000000e+00> : vector<8xf32>
    %6 = vector.multi_reduction <add>, %5, %cst [1] : vector<8x128xf32> to vector<8xf32>
    %7 = vector.shape_cast %6 : vector<8xf32> to vector<8x1xf32>
    %8 = arith.mulf %3, %3 : vector<8x128xf32>
    %cst_4 = arith.constant dense<0.000000e+00> : vector<8xf32>
    %9 = vector.multi_reduction <add>, %8, %cst_4 [1] : vector<8x128xf32> to vector<8xf32>
    %10 = vector.shape_cast %9 : vector<8xf32> to vector<8x1xf32>
    %11 = arith.mulf %4, %4 : vector<8x128xf32>
    %cst_5 = arith.constant dense<0.000000e+00> : vector<8xf32>
    %12 = vector.multi_reduction <add>, %11, %cst_5 [1] : vector<8x128xf32> to vector<8xf32>
    %13 = vector.shape_cast %12 : vector<8xf32> to vector<8x1xf32>
    %14 = arith.mulf %10, %13 : vector<8x1xf32>
    %cst_6 = arith.constant 0.000000e+00 : f32
    %15 = vector.broadcast %cst_6 : f32 to vector<8x1xf32>
    %16 = arith.cmpf ogt, %14, %15 : vector<8x1xf32>
    %cst_7 = arith.constant 1.000000e+00 : f32
    %17 = vector.broadcast %cst_7 : f32 to vector<8x1xf32>
    %18 = arith.select %16, %14, %17 : vector<8x1xi1>, vector<8x1xf32>
    %19 = math.rsqrt %18 : vector<8x1xf32>
    %20 = arith.mulf %7, %19 : vector<8x1xf32>
    %c0_8 = arith.constant 0 : index
    %c0_9 = arith.constant 0 : index
    %c0_10 = arith.constant 0 : index
    %21 = vector.load %arg5[%c0_8, %c0_9, %c0_10] : memref<1x8x128xf32, #tpu.memory_space<vmem>>, vector<1x8x128xf32>
    %22 = vector.shape_cast %20 : vector<8x1xf32> to vector<1x8x1xf32>
    %cst_11 = arith.constant dense<0.000000e+00> : vector<1xf32>
    %23 = vector.multi_reduction <add>, %22, %cst_11 [1, 2] : vector<1x8x1xf32> to vector<1xf32>
    %24 = vector.shape_cast %23 : vector<1xf32> to vector<1x1x1xf32>
    %25 = vector.extract %24[0, 0, 0] : f32 from vector<1x1x1xf32>
    %26 = vector.broadcast %25 : f32 to vector<1x8x128xf32>
    %27 = arith.addf %21, %26 : vector<1x8x128xf32>
    %c0_12 = arith.constant 0 : index
    %c0_13 = arith.constant 0 : index
    %c0_14 = arith.constant 0 : index
    %28 = vector.load %arg5[%c0_12, %c0_13, %c0_14] : memref<1x8x128xf32, #tpu.memory_space<vmem>>, vector<1x8x128xf32>
    tpu.vector_store %arg5[%c0_12, %c0_13, %c0_14], %27 {strides = array<i32>} : memref<1x8x128xf32, #tpu.memory_space<vmem>>, vector<1x8x128xf32>,
    %c0_i32_15 = arith.constant 0 : i32
    %29 = arith.cmpi eq, %arg1, %c0_i32_15 : i32
    %30 = arith.extui %29 : i1 to i32
    %c0_i32_16 = arith.constant 0 : i32
    %31 = arith.cmpi ne, %30, %c0_i32_16 : i32
    scf.if %31 {
      %c0_17 = arith.constant 0 : index
      %c0_18 = arith.constant 0 : index
      %c0_19 = arith.constant 0 : index
      %32 = vector.load %arg5[%c0_17, %c0_18, %c0_19] : memref<1x8x128xf32, #tpu.memory_space<vmem>>, vector<1x8x128xf32>
      %c0_20 = arith.constant 0 : index
      %c0_21 = arith.constant 0 : index
      %c0_22 = arith.constant 0 : index
      %33 = vector.load %arg4[%c0_20, %c0_21, %c0_22] : memref<1x8x128xf32, #tpu.memory_space<vmem>>, vector<1x8x128xf32>
      tpu.vector_store %arg4[%c0_20, %c0_21, %c0_22], %32 {strides = array<i32>} : memref<1x8x128xf32, #tpu.memory_space<vmem>>, vector<1x8x128xf32>,
    } else {
    }
    return
  }
  func.func @transform_0(%arg0: i32, %arg1: i32) -> (i32, i32) {
    %c1_i32 = arith.constant 1 : i32
    %0 = arith.muli %arg0, %c1_i32 : i32
    %1 = arith.addi %0, %arg1 : i32
    %c0_i32 = arith.constant 0 : i32
    %c0_i32_0 = arith.constant 0 : i32
    return %1, %c0_i32 : i32, i32
  }
  func.func @transform_1(%arg0: i32, %arg1: i32) -> (i32, i32) {
    %c1_i32 = arith.constant 1 : i32
    %0 = arith.muli %arg0, %c1_i32 : i32
    %1 = arith.addi %0, %arg1 : i32
    %c0_i32 = arith.constant 0 : i32
    %c0_i32_0 = arith.constant 0 : i32
    return %1, %c0_i32 : i32, i32
  }
  func.func @transform_2(%arg0: i32, %arg1: i32) -> (i32, i32, i32) {
    %c0_i32 = arith.constant 0 : i32
    %c0_i32_0 = arith.constant 0 : i32
    %c0_i32_1 = arith.constant 0 : i32
    return %arg0, %c0_i32, %c0_i32_0 : i32, i32, i32
  }
}

</mosaic_0001>

<bundles_post_ra>
// kernel: tpu_custom_call.1
= control target key start
LH: loop header
LB: loop body
LE: loop exit
PB: predicated region body
PF: predicated region fallthrough
CT: control target
= control target key end

     0   :  { %7 = vsyncpa [#allocation4], 0  ;;  %s852_s0 = inlined_call_operand.hbm [shape: f32[16,128], index: 0, kind: input, shape index: {}]   ;;  %s853_s1 = inlined_call_operand.hbm [shape: f32[16,128], index: 1, kind: input, shape index: {}]   ;;  %s854_s2 = inlined_call_operand.hbm [shape: f32[2,8,128], index: 2, kind: output, shape index: {}]  }
   0x1   :  { %9 = vsyncpa [#allocation4 + $0x1], 0 }
   0x2   :  { %10 = vsyncpa [#allocation7], 0 }
   0x3   :  { %12 = vsyncpa [#allocation7 + $0x1], 0 }
   0x4   :  { %13 = vsyncpa [#allocation5], 0 }
   0x5   :  { %15 = vsyncpa [#allocation5 + $0x1], 0  ;;  %s627_s9 = smov 0   ;;  %s629_s10 = smov 0  }
   0x6   :  { %s631_s11 = smov 0   ;;  %s633_s12 = smov 0  }
   0x7   :  { %s635_s13 = smov 0   ;;  %s637_s14 = smov 0  }
   0x8 LB: > { %s374_s15 = sadd.s32 4294967295, %s607_s14   ;;  %s375_s16 = sadd.s32 4294967294, %s607_s14   ;;  %s607_s14 = sphi %s637_s14, %s21_s14   ;;  %s603_s13 = sphi %s635_s13, %s874_s13   ;;  %s599_s12 = sphi %s633_s12, %s873_s12   ;;  %s595_s11 = sphi %s631_s11, %s872_s11   ;;  %s591_s10 = sphi %s629_s10, %s871_s10   ;;  %s587_s9 = sphi %s627_s9, %s870_s9  }
   0x9   : > { %s33_s17 = sadd.s32 1, %s603_s13  ;;  %s42_s18 = sadd.s32 1, %s595_s11 }
   0xa   : > { %p35_p0 = scmp.ge.s32.totalorder %s33_s17, 2  ;;  %p49_p1 = scmp.ne.s32.totalorder %s595_s11, %s591_s10 }
   0xb   : > { %p50_p2 = scmp.eq.s32.totalorder %s607_s14, 0  ;;  %p55_p3 = scmp.ne.s32.totalorder %s591_s10, %s587_s9 }
   0xc   : > { %s876_s17 = smov (%p35_p0, %s33_s17), 0  ;;  %p56_p5 = scmp.eq.s32.totalorder %s374_s15, 0 }
   0xd   : > { %p668_p4 = por %p50_p2, %p49_p1  ;;  %s39_s20 = ssub.s32 %s603_s13, %s876_s17 }
   0xe   : > { %p107_p6 = scmp.eq.s32.totalorder %s374_s15, 1  ;;  %p40_p7 = scmp.eq.s32.totalorder %s39_s20, 0 }
   0xf   : > { %p674_p8 = por %p56_p5, %p55_p3  ;;  %p113_p10 = scmp.eq.s32.totalorder %s375_s16, 1 }
  0x10   : > { %p678_p9 = por %p107_p6, %p49_p1  ;;  %p409_p13 = scmp.lt.s32.totalorder %s607_s14, 2 }
  0x11   : > { %s858_s21 = scalar_select %p674_p8, 1, 0 }
  0x12   : > { %s859_s22 = scalar_select %p678_p9, 1, 0 }
  0x13   : > { %s683_s23 = scalar_select %p40_p7, %s595_s11, %s42_s18  }
  0x14   : > { %p685_p11 = por %p113_p10, %p55_p3  ;;  %s692_s25 = sand.u32 1, %s595_s11  }
  0x15   : > { %s378_s26 = sshll.u32 %s692_s25, 3  ;;  %s379_s27 = sshll.u32 %s603_s13, 7 }
  0x16   : > { %s860_s24 = scalar_select %p685_p11, 1, 0 }
  0x17   : > { %s701_s30 = scalar_lea.hbm %s852_s0, %s379_s27  ;;  %s137_s3 = scalar_lea.vmem [#allocation3], %s378_s26 }
  0x18   : > { %s145_s4 = sshll.u32 %s137_s3, 4  ;;  %p709_p0 = pnand %p409_p13, %p668_p4  ;;  %s705_s4 = int_to_ptr.vmem [resolvable:$true] %s145_s4 }
  0x19   : > { %s134_s6 = scalar_lea.sflag [#allocation4], %s692_s25  ;;  %s461_s7 = scalar_lea.hbm %s701_s30, 128 }
  0x1a   : > { %p462_p3 = scmp.ne.s32.totalorder %s701_s30, %s461_s7  ;;  %p463_p5 = pneg %p709_p0 }
  0x1b   : > { %s466_s16 = scalar_lea.hbm %s852_s0, 256  ;;  %p467_p4 = scmp.lt.u32.totalorder %s701_s30, %s852_s0 }
  0x1c   : > { %p464_p6 = pnand %p463_p5, %p462_p3  ;;  %p468_p10 = scmp.lt.u32.totalorder %s466_s16, %s461_s7 }
  0x1d   : > { %p470_p12 = scmp.lt.u32.totalorder %s461_s7, %s701_s30 }
  0x1e   : > { %p465_p7 = pneg %p464_p6  ;;  %p469_p13 = por %p468_p10, %p467_p4 }
  0x20   : > { %p471_p1 = por %p470_p12, %p469_p13 }
  0x22   : > { %p472_p2 = pnand %p471_p1, %p465_p7 }
  0x24   : > { %475 = shalt.err (!%p472_p2)
}
  0x25   : > { %s476_s20 = scalar_lea.vmem %s705_s4, 128  ;;  %s609_s28 = smov [#allocation3]  }
  0x26   : > { %p477_p3 = scmp.ne.s32.totalorder %s705_s4, %s476_s20  ;;  %s481_s29 = sshll.u32 %s609_s28, 4  ;;  %s482_s29 = int_to_ptr.vmem [resolvable:$false] %s481_s29 }
  0x27   : > { %s483_s3 = scalar_lea.vmem %s482_s29, 256  ;;  %p484_p9 = scmp.lt.s32.totalorder %s705_s4, %s482_s29 }
  0x28   : > { %p479_p6 = pnand %p477_p3, %p463_p5  ;;  %p485_p4 = scmp.lt.s32.totalorder %s483_s3, %s476_s20 }
  0x2a   : > { %p480_p11 = pneg %p479_p6  ;;  %p486_p10 = por %p485_p4, %p484_p9 }
  0x2c   : > { %p487_p12 = pnand %p486_p10, %p480_p11 }
  0x2e   : > { %490 = shalt.err (!%p487_p12)
}
  0x2f   : > { %401 = dma.hbm_to_vmem [thread:$0]  (!%p709_p0), %s701_s30, 128, %s705_s4, %s134_s6  }
  0x30   : > { %p862_p1 = scmp.lt.s32.totalorder %s607_s14, 3  ;;  %p863_p2 = scmp.ge.s32.totalorder %s607_s14, 1 }
  0x31   : > { %s754_s16 = scalar_lea.hbm %s853_s1, %s379_s27  ;;  %s156_s18 = scalar_lea.vmem [#allocation6], %s378_s26 }
  0x32   : > { %p745_p7 = pnand %p863_p2, %p862_p1  ;;  %s164_s19 = sshll.u32 %s156_s18, 4  ;;  %s165_s19 = int_to_ptr.vmem [resolvable:$true] %s164_s19 }
  0x33   : > { %s153_s30 = scalar_lea.sflag [#allocation7], %s692_s25  ;;  %s491_s4 = scalar_lea.hbm %s754_s16, 128 }
  0x34   : > { %s864_s7 = scalar_select %p745_p7, 1, 0 }
  0x35   : > { %p492_p9 = scmp.ne.s32.totalorder %s754_s16, %s491_s4  ;;  %s496_s27 = scalar_lea.hbm %s853_s1, 256 }
  0x36   : > { %p497_p3 = scmp.lt.u32.totalorder %s754_s16, %s853_s1  ;;  %p498_p6 = scmp.lt.u32.totalorder %s496_s27, %s491_s4 }
  0x37   : > { %p494_p11 = pnand %p492_p9, %p463_p5  ;;  %p500_p10 = scmp.lt.u32.totalorder %s491_s4, %s754_s16 }
  0x38   : > { %p499_p4 = por %p498_p6, %p497_p3 }
  0x39   : > { %p495_p13 = pneg %p494_p11 }
  0x3a   : > { %p501_p12 = por %p500_p10, %p499_p4 }
  0x3c   : > { %p502_p1 = pnand %p501_p12, %p495_p13 }
  0x3e   : > { %505 = shalt.err (!%p502_p1)
}
  0x3f   : > { %s506_s25 = scalar_lea.vmem %s165_s19, 128  ;;  %s610_s26 = smov [#allocation6]  }
  0x40   : > { %p507_p2 = scmp.ne.s32.totalorder %s165_s19, %s506_s25  ;;  %s511_s3 = sshll.u32 %s610_s26, 4  ;;  %s512_s3 = int_to_ptr.vmem [resolvable:$false] %s511_s3 }
  0x41   : > { %s513_s8 = scalar_lea.vmem %s512_s3, 256  ;;  %p514_p8 = scmp.lt.s32.totalorder %s165_s19, %s512_s3 }
  0x42   : > { %p509_p9 = pnand %p507_p2, %p463_p5  ;;  %p515_p7 = scmp.lt.s32.totalorder %s513_s8, %s506_s25 }
  0x44   : > { %p510_p11 = pneg %p509_p9  ;;  %p516_p3 = por %p515_p7, %p514_p8 }
  0x46   : > { %p517_p6 = pnand %p516_p3, %p510_p11 }
  0x48   : > { %520 = shalt.err (!%p517_p6)
}
  0x49   : > { %404 = dma.hbm_to_vmem [thread:$0]  (!%p709_p0), %s754_s16, 128, %s165_s19, %s153_s30  }
  0x4a   : > { %p865_p13 = scmp.ne.s32.totalorder %s864_s7, 0 }
  0x4b   : > { %s781_s15 = sand.u32 (!%p865_p13), 1, %s591_s10   ;;  %p866_p8 = scmp.ne.s32.totalorder (!%p865_p13), %s858_s21, 0 }
  0x4c   : > { %173 = sbr.rel (%p865_p13) target bundleno = 472 (0x1d8), region = 28  ;;  %s784_s18 = sshll.u32 (!%p865_p13), %s781_s15, 3 }
  0x4d   : > { %s176_s4 = scalar_lea.sflag (!%p865_p13), [#allocation4], %s781_s15  ;;  %s179_s6 = scalar_lea.vmem (!%p865_p13), [#allocation3], %s784_s18 }
  0x53   : > { %574 = dma.done.wait (%p866_p8), %s176_s4, 128  }
  0x54   : > { %576 = vsyncadd (%p866_p8), %s176_s4, 4294967168  ;;  %s185_s5 = scalar_lea.sflag [#allocation7], %s781_s15  ;;  %s188_s7 = scalar_lea.vmem [#allocation6], %s784_s18 }
  0x55   : > { %578 = dma.done.wait (%p866_p8), %s185_s5, 128  }
  0x56   : > { %580 = vsyncadd (%p866_p8), %s185_s5, 4294967168  ;;  %v221_v0 = vld [vmem:[%s179_s6] sm:$0xff]  ;;  %v222_v1 = vld [vmem:[%s188_s7] sm:$0xff]  ;;  %vm238_vm1 = vcmask 7168   ;;  %s213_s21 = scalar_lea.vmem [#allocation8], %s784_s18  ;;  %s387_s19 = sshll.u32 %s599_s12, 7 }
  0x57   : > { %v226_v2 = vmul.f32 %v221_v0, %v221_v0  ;;  %v223_v3 = vmul.f32 %v222_v1, %v221_v0  ;;  %v229_v4 = vmul.f32 %v222_v1, %v222_v1  ;;  %s271_s16 = sshll.u32 %s213_s21, 4  ;;  %s805_s28 = scalar_lea.hbm %s854_s2, %s387_s19  ;;  %s800_s16 = int_to_ptr.vmem [resolvable:$true] %s271_s16 }
  0x58   : > { %s258_s29 = scalar_lea.sflag [#allocation5], %s781_s15  ;;  %s521_s25 = scalar_lea.vmem %s800_s16, 128 }
  0x59   : > { %227 = vadd.xlane.f32.xlu0 %v226_v2  ;;  %224 = vadd.xlane.f32.xlu1 %v223_v3  ;;  %p522_p0 = scmp.ne.s32.totalorder %s800_s16, %s521_s25  ;;  %p867_p5 = scmp.ne.s32.totalorder %s859_s22, 0 }
  0x5a   : > { %s611_s12 = smov [#allocation8]  }
  0x5b   : > { %p523_p7 = pnand %p522_p0, %p867_p5  ;;  %s525_s26 = sshll.u32 %s611_s12, 4  ;;  %s526_s26 = int_to_ptr.vmem [resolvable:$false] %s525_s26 }
  0x5c   : > { %s527_s3 = scalar_lea.vmem %s526_s26, 256  ;;  %p528_p10 = scmp.lt.s32.totalorder %s800_s16, %s526_s26 }
  0x5d   : > { %230 = vadd.xlane.f32.xlu0 %v229_v4  ;;  %p524_p4 = pneg %p523_p7  ;;  %p529_p12 = scmp.lt.s32.totalorder %s527_s3, %s521_s25 }
  0x5f   : > { %p530_p1 = por %p529_p12, %p528_p10 }
  0x61   : > { %p531_p2 = pnand %p530_p1, %p524_p4 }
  0xe6   : > { %v228_v5 = vpop.xlane.xlu0 %227  ;;  %v225_v9 = vpop.xlane.xlu1 %224 }
  0xea   : > { %v231_v6 = vpop.xlane.xlu0 %230 }
  0xeb   : > { %v232_v7 = vmul.f32 %v231_v6, %v228_v5 }
  0xed   : > { %vm233_vm0 = vcmp.gt.f32.partialorder %v232_v7, 0.0 }
  0xee   : > { %v234_v8 = vsel %vm233_vm0, %v232_v7, 1.0 }
  0xef   : > { %459 = vrsqrt.f32 %v234_v8 }
  0xf9   : > { %v460_v10 = vpop.eup %459 }
  0xfa   : > { %v236_v11 = vmul.f32 %v460_v10, %v225_v9 }
  0xfc   : > { %v239_v12 = vsel %vm238_vm1, %v236_v11, 0.0 }
  0xfd   : > { %240 = vadd.xlane.f32.xlu1 %v239_v12 }
 0x18a   : > { %v241_v13 = vpop.xlane.xlu1 %240 }
 0x18b   : > { %v242_v14 = vrot.slane %v241_v13, 4 }
 0x18d   : > { %v243_v15 = vadd.f32 %v242_v14, %v241_v13 }
 0x18f   : > { %v244_v16 = vrot.slane %v243_v15, 2 }
 0x191   : > { %v245_v17 = vadd.f32 %v244_v16, %v243_v15 }
 0x193   : > { %v246_v18 = vrot.slane %v245_v17, 1 }
 0x195   : > { %v247_v19 = vadd.f32 %v246_v18, %v245_v17 }
 0x197   : > { %390 = vpush %v247_v19 }
 0x1c8   : > { %s391_s30 = spop %390 }
 0x1c9   : > { %v249_v20 = vstv %s391_s30 }
 0x1ca   : > { %256 = vst [vmem:[%s213_s21] sm:$0xff] %v249_v20 }
 0x1cb   : > { %534 = shalt.err (!%p531_p2)
}
 0x1cc   : > { %s535_s8 = scalar_lea.hbm %s805_s28, 128  ;;  %s539_s4 = scalar_lea.hbm %s854_s2, 256 }
 0x1cd   : > { %p536_p9 = scmp.ne.s32.totalorder %s805_s28, %s535_s8  ;;  %p540_p6 = scmp.lt.u32.totalorder %s805_s28, %s854_s2 }
 0x1ce   : > { %p541_p13 = scmp.lt.u32.totalorder %s539_s4, %s535_s8  ;;  %p543_p0 = scmp.lt.u32.totalorder %s535_s8, %s805_s28 }
 0x1cf   : > { %p537_p11 = pnand %p536_p9, %p867_p5 }
 0x1d0   : > { %p542_p8 = por %p541_p13, %p540_p6 }
 0x1d1   : > { %p538_p3 = pneg %p537_p11 }
 0x1d2   : > { %p544_p7 = por %p543_p0, %p542_p8 }
 0x1d4   : > { %p545_p4 = pnand %p544_p7, %p538_p3 }
 0x1d6   : > { %548 = shalt.err (!%p545_p4)
}
 0x1d7   : > { %396 = dma.vmem_to_hbm [thread:$0]  (%p867_p5), %s800_s16, 128, %s805_s28, %s258_s29  }
 0x1d8 PF: > { %s283_s7 = sand.u32 1, %s587_s9   ;;  %p868_p10 = scmp.ne.s32.totalorder %s860_s24, 0 }
 0x1d9   : > { %p869_p12 = scmp.ge.s32.totalorder %s607_s14, 2  ;;  %s284_s21 = scalar_lea.sflag [#allocation5], %s283_s7 }
 0x1db   : > { %p406_p1 = pnand %p869_p12, %p868_p10 }
 0x1dd   : > { %582 = dma.done.wait (!%p406_p1), %s284_s21, 128  }
 0x1de   : > { %584 = vsyncadd (!%p406_p1), %s284_s21, 4294967168  ;;  %s21_s14 = sadd.s32 1, %s607_s14   ;;  %s870_s9 = smov %s591_s10 }
 0x1df   : > { %p18_p2 = scmp.ge.s32.totalorder %s21_s14, 4   ;;  %s871_s10 = smov %s595_s11 }
 0x1e0   : > { %s872_s11 = smov %s683_s23  ;;  %s873_s12 = smov %s603_s13 }
 0x1e1   : > { %s874_s13 = smov %s876_s17  ;;  %20 = sbr.rel (!%p18_p2) target bundleno = 8 (0x8), region = 94 }
 0x1e8   :  { %289 = vsyncpa [#allocation4], 1 }
 0x1e9   :  { %291 = vsyncpa [#allocation4 + $0x1], 1 }
 0x1ea   :  { %292 = vsyncpa [#allocation7], 1 }
 0x1eb   :  { %294 = vsyncpa [#allocation7 + $0x1], 1 }
 0x1ec   :  { %295 = vsyncpa [#allocation5], 1 }
 0x1ed   :  { %297 = vsyncpa [#allocation5 + $0x1], 1 }

</bundles_post_ra>
